<compile_context>
chip_gen: v7x
topology: tpu7x:2x2x1
jax: 0.10.0
libtpu: 0.0.40
codegen_flags: <defaults>
</compile_context>

<pallas_src>
import functools

import jax
import jax.numpy as jnp
from jax.experimental import pallas as pl
from jax.experimental.pallas import tpu as pltpu


def _cosface_kernel(labels_ref, logits_ref, out_ref, *, s, ms, tc):
    """One (tm, tc) tile: out = logits * s - (m*s at the target class)."""
    j = pl.program_id(1)                               # column-tile index
    labels = labels_ref[...]                           # (tm, 1) int32
    x = logits_ref[...].astype(jnp.float32)            # (tm, tc), f32 compute

    # Grid-invariant iota; shift the (tm, 1) labels instead of the full tile.
    col = jax.lax.broadcasted_iota(jnp.int32, x.shape, 1)
    # Hit exactly at the target-class position.  labels == -1 (or any label
    # outside this tile / outside [0, C)) never matches -> row passes through.
    hit = col == (labels - j * tc)

    out = x * jnp.float32(s) - jnp.where(hit, jnp.float32(ms), jnp.float32(0.0))
    out_ref[...] = out.astype(out_ref.dtype)


def cosface(logits: jax.Array, labels: jax.Array, *, s: float = 64.0,
            m: float = 0.4, block_rows: int = 256,
            block_cols: int = 4096) -> jax.Array:
    """CosFace margin + scaling, computed in a single tiled Pallas kernel."""
    N, C = logits.shape
    labels2d = labels.astype(jnp.int32).reshape(N, 1)

    itemsize = jnp.dtype(logits.dtype).itemsize
    # Minimum legal sublane tile: 8 rows for f32, 16 for bf16, 32 for int8/fp8.
    min_rows = max(8, 32 // itemsize)

    # Row tile: either the full N, or a multiple of min_rows.
    tm = min(block_rows, N)
    if tm < N:
        tm = max(min_rows, (tm // min_rows) * min_rows)

    # Column tile (lane axis): either the full C, or a multiple of 128.
    tc = min(block_cols, C)
    if tc < C:
        tc = max(128, (tc // 128) * 128)

    grid = (pl.cdiv(N, tm), pl.cdiv(C, tc))

    # VMEM working set: logits in + out, double-buffered, plus the tiny
    # (lane-padded) labels block.  2x headroom, capped generation-aware at
    # 75% of the chip's physical VMEM (fits v7x's 64 MiB, allows bigger tiles
    # on v5e/v6e's 128 MiB).
    block_bytes = tm * tc * itemsize
    labels_bytes = tm * 128 * 4
    working = 2 * 2 * block_bytes + 2 * labels_bytes
    try:
        vmem_capacity = int(pltpu.get_tpu_info().vmem_capacity_bytes)
    except Exception:
        vmem_capacity = 128 << 20
    vmem_limit = int(min(max(2 * working, 16 << 20), (3 * vmem_capacity) // 4))

    kernel = functools.partial(_cosface_kernel, s=float(s),
                               ms=float(m) * float(s), tc=tc)
    return pl.pallas_call(
        kernel,
        out_shape=jax.ShapeDtypeStruct((N, C), logits.dtype),
        grid_spec=pltpu.PrefetchScalarGridSpec(
            num_scalar_prefetch=0,
            grid=grid,
            in_specs=[
                # labels: block index fixed across the inner (column) axis, so
                # it is only re-fetched when the row tile changes.
                pl.BlockSpec((tm, 1), lambda i, j: (i, 0)),
                pl.BlockSpec((tm, tc), lambda i, j: (i, j)),   # logits
            ],
            out_specs=pl.BlockSpec((tm, tc), lambda i, j: (i, j)),
        ),
        # Alias logits (input #1) to the output: no second N*C HBM buffer.
        input_output_aliases={1: 0},
        compiler_params=pltpu.CompilerParams(
            # Row axis parallel (v7x 2-TC split on disjoint row bands),
            # column axis arbitrary (sequential stream per core).
            dimension_semantics=("parallel", "arbitrary"),
            vmem_limit_bytes=vmem_limit,
        ),
    )(labels2d, logits)


def _reference(logits, labels, s=64.0, m=0.4):
    # Pure-JAX reference mirroring the PyTorch semantics.
    N, C = logits.shape
    valid = labels != -1
    one_hot = (jnp.arange(C)[None, :] == labels[:, None]) & valid[:, None]
    return (logits - m * one_hot.astype(logits.dtype)) * s


if __name__ == "__main__":
    key = jax.random.PRNGKey(0)
    k1, k2 = jax.random.split(key)

    # Small but multi-tile test: force block_rows/cols below N/C so the
    # grid is (2, 4) and the label-shift / column-tile logic is exercised.
    N, C = 256, 1024
    logits = jax.random.uniform(k1, (N, C), dtype=jnp.float32,
                                minval=-1.0, maxval=1.0)
    labels = jax.random.randint(k2, (N,), 0, C, dtype=jnp.int32)
    # Mark a couple of rows as "ignore" (-1), like the torch.where filter.
    labels = labels.at[1].set(-1).at[5].set(-1)

    ref = _reference(logits, labels, s=64.0, m=0.4)

    out = cosface(logits, labels, s=64.0, m=0.4,
                  block_rows=128, block_cols=256)
    out = jax.block_until_ready(out)
    assert jnp.allclose(out, ref, atol=1e-4, rtol=1e-5), "mismatch vs reference"

    # Also exercise the default (single-tile at this size) path.
    out2 = jax.block_until_ready(cosface(logits, labels, s=64.0, m=0.4))
    assert jnp.allclose(out2, ref, atol=1e-4, rtol=1e-5), "mismatch (defaults)"

    print("KERNEL_OK")
</pallas_src>

<mosaic_0001>
module attributes {stable_mosaic.version = 11 : i64} {
  func.func @_cosface_kernel(%arg0: i32, %arg1: i32, %arg2: memref<128x1xi32, #tpu.memory_space<vmem>>, %arg3: memref<128x256xf32, #tpu.memory_space<vmem>>, %arg4: memref<128x256xf32, #tpu.memory_space<vmem>>) attributes {dimension_semantics = [#tpu.dimension_semantics<parallel>, #tpu.dimension_semantics<arbitrary>], iteration_bounds = array<i64: 2, 4>, scalar_prefetch = 0 : i64, scratch_operands = 0 : i64, tpu.core_type = #tpu.core_type<tc>, window_params = [{transform_indices = @transform_0, window_bounds = array<i64: 128, 1>}, {transform_indices = @transform_1, window_bounds = array<i64: 128, 256>}, {transform_indices = @transform_2, window_bounds = array<i64: 128, 256>}]} {
    %c0 = arith.constant 0 : index
    %c0_0 = arith.constant 0 : index
    %0 = vector.load %arg2[%c0, %c0_0] : memref<128x1xi32, #tpu.memory_space<vmem>>, vector<128x1xi32>
    %c0_1 = arith.constant 0 : index
    %c0_2 = arith.constant 0 : index
    %1 = vector.load %arg3[%c0_1, %c0_2] : memref<128x256xf32, #tpu.memory_space<vmem>>, vector<128x256xf32>
    %2 = tpu.iota {dimensions = array<i32: 1>} : vector<128x256xi32>
    %c256_i32 = arith.constant 256 : i32
    %3 = arith.muli %arg1, %c256_i32 : i32
    %4 = vector.broadcast %3 : i32 to vector<128x1xi32>
    %5 = arith.subi %0, %4 : vector<128x1xi32>
    %6 = vector.broadcast %5 : vector<128x1xi32> to vector<128x256xi32>
    %7 = arith.cmpi eq, %2, %6 : vector<128x256xi32>
    %cst = arith.constant 6.400000e+01 : f32
    %8 = vector.broadcast %cst : f32 to vector<128x256xf32>
    %9 = arith.mulf %1, %8 : vector<128x256xf32>
    %cst_3 = arith.constant 2.560000e+01 : f32
    %cst_4 = arith.constant 0.000000e+00 : f32
    %10 = vector.broadcast %cst_3 : f32 to vector<128x256xf32>
    %11 = vector.broadcast %cst_4 : f32 to vector<128x256xf32>
    %12 = arith.select %7, %10, %11 : vector<128x256xi1>, vector<128x256xf32>
    %13 = arith.subf %9, %12 : vector<128x256xf32>
    %c0_5 = arith.constant 0 : index
    %c0_6 = arith.constant 0 : index
    %14 = vector.load %arg4[%c0_5, %c0_6] : memref<128x256xf32, #tpu.memory_space<vmem>>, vector<128x256xf32>
    tpu.vector_store %arg4[%c0_5, %c0_6], %13 {strides = array<i32>} : memref<128x256xf32, #tpu.memory_space<vmem>>, vector<128x256xf32>,
    return
  }
  func.func @transform_0(%arg0: i32, %arg1: i32) -> (i32, i32) {
    %c0_i32 = arith.constant 0 : i32
    %c0_i32_0 = arith.constant 0 : i32
    return %arg0, %c0_i32 : i32, i32
  }
  func.func @transform_1(%arg0: i32, %arg1: i32) -> (i32, i32) {
    %c0_i32 = arith.constant 0 : i32
    return %arg0, %arg1 : i32, i32
  }
  func.func @transform_2(%arg0: i32, %arg1: i32) -> (i32, i32) {
    %c0_i32 = arith.constant 0 : i32
    return %arg0, %arg1 : i32, i32
  }
}

</mosaic_0001>

<bundles_post_ra>
// kernel: tpu_custom_call.1
= control target key start
LH: loop header
LB: loop body
LE: loop exit
PB: predicated region body
PF: predicated region fallthrough
CT: control target
= control target key end

     0   :  { %7 = vsyncpa [#allocation3], 0  ;;  %s1283_s0 = inlined_call_operand.vmem [shape: s32[256,1], index: 0, kind: input, shape index: {}]   ;;  %s1284_s1 = inlined_call_operand.hbm [shape: f32[256,1024], index: 1, kind: input, shape index: {}, may-alias: {1,2}]   ;;  %s1285_s2 = inlined_call_operand.hbm [shape: f32[256,1024], index: 2, kind: output, shape index: {}, may-alias: {1,2}]  }
   0x1   :  { %9 = vsyncpa [#allocation3 + $0x1], 0 }
   0x2   :  { %10 = vsyncpa [#allocation4], 0 }
   0x3   :  { %12 = vsyncpa [#allocation4 + $0x1], 0  ;;  %s870_s9 = smov 0   ;;  %s872_s10 = smov 0  }
   0x4   :  { %s874_s11 = smov 0   ;;  %s876_s12 = smov 0  }
   0x5   :  { %s878_s13 = smov 0   ;;  %s880_s14 = smov 0  }
   0x6   :  { %s882_s15 = smov 0   ;;  %s884_s16 = smov 0  }
   0x7 LB: > { %s603_s17 = sadd.s32 4294967295, %s843_s16   ;;  %s604_s18 = sadd.s32 4294967294, %s843_s16   ;;  %s843_s16 = sphi %s884_s16, %s18_s16   ;;  %s839_s15 = sphi %s882_s15, %s1301_s15   ;;  %s835_s14 = sphi %s880_s14, %s1300_s14   ;;  %s831_s13 = sphi %s878_s13, %s1299_s13   ;;  %s827_s12 = sphi %s876_s12, %s1298_s12   ;;  %s823_s11 = sphi %s874_s11, %s1297_s11   ;;  %s819_s10 = sphi %s872_s10, %s1296_s10   ;;  %s815_s9 = sphi %s870_s9, %s1295_s9  }
   0x8   : > { %s27_s19 = sadd.s32 1, %s835_s14  ;;  %s30_s20 = sadd.s32 1, %s839_s15 }
   0x9   : > { %p28_p0 = scmp.ge.s32.totalorder %s27_s19, 4  ;;  %s65_s21 = sadd.s32 1, %s823_s11 }
   0xa   : > { %p72_p1 = scmp.ne.s32.totalorder %s823_s11, %s819_s10  ;;  %p73_p2 = scmp.eq.s32.totalorder %s843_s16, 0 }
   0xb   : > { %s1303_s19 = smov (%p28_p0, %s27_s19), 0  ;;  %s1305_s20 = smov (!%p28_p0, %s30_s20), %s839_s15 }
   0xc   : > { %s61_s22 = ssub.s32 %s835_s14, %s1303_s19  ;;  %p923_p3 = por %p73_p2, %p72_p1 }
   0xd   : > { %p32_p4 = scmp.ge.s32.totalorder %s1305_s20, 2  ;;  %p78_p5 = scmp.ne.s32.totalorder %s819_s10, %s815_s9 }
   0xe   : > { %p79_p6 = scmp.eq.s32.totalorder %s603_s17, 0  ;;  %p104_p7 = scmp.eq.s32.totalorder %s603_s17, 7 }
   0xf   : > { %s1307_s20 = smov (%p32_p4, %s1305_s20), 0  ;;  %p110_p10 = scmp.eq.s32.totalorder %s604_s18, 7 }
  0x10   : > { %p931_p8 = por %p79_p6, %p78_p5  ;;  %p935_p9 = por %p104_p7, %p72_p1 }
  0x11   : > { %s60_s26 = ssub.s32 %s839_s15, %s1307_s20  ;;  %p941_p12 = por %p110_p10, %p78_p5 }
  0x12   : > { %s1289_s25 = scalar_select %p935_p9, 1, 0 }
  0x13   : > { %s62_s27 = sor.u32 %s61_s22, %s60_s26  ;;  %p639_p13 = scmp.lt.s32.totalorder %s843_s16, 8 }
  0x14   : > { %p63_p11 = scmp.eq.s32.totalorder %s62_s27, 0  ;;  %s139_s29 = sand.u32 1, %s823_s11  }
  0x15   : > { %s1290_s28 = scalar_select %p941_p12, 1, 0 }
  0x16   : > { %s948_s30 = scalar_select %p63_p11, %s823_s11, %s65_s21  }
  0x17   : > { %s607_s3 = sshll.u32 %s139_s29, 8  ;;  %s609_s4 = sshll.u32 %s835_s14, 1 }
  0x18   : > { %s625_s5 = sshll.u32 %s839_s15, 7  ;;  %s143_s6 = scalar_lea.vmem [#allocation2], %s607_s3 }
  0x19   : > { %s153_s7 = sshll.u32 %s143_s6, 4  ;;  %s150_s8 = sadd.s32 %s625_s5, %s609_s4  ;;  %s952_s7 = int_to_ptr.vmem [resolvable:$true] %s153_s7 }
  0x1a   : > { %s611_s17 = sshll.u32 %s150_s8, 7  ;;  %p956_p0 = pnand %p639_p13, %p923_p3 }
  0x1b   : > { %s963_s21 = scalar_lea.hbm %s1284_s1, %s611_s17  ;;  %s966_s27 = scalar_lea.sflag [#allocation3], %s139_s29 }
  0x1c   : > { %s715_s3 = scalar_lea.hbm %s963_s21, 4096  ;;  %p717_p3 = pneg %p956_p0 }
  0x1d   : > { %p716_p2 = scmp.ne.s32.totalorder %s963_s21, %s715_s3  ;;  %s720_s5 = scalar_lea.hbm %s1284_s1, 32768 }
  0x1e   : > { %p721_p6 = scmp.lt.u32.totalorder %s963_s21, %s1284_s1  ;;  %p722_p7 = scmp.lt.u32.totalorder %s720_s5, %s715_s3 }
  0x1f   : > { %p718_p4 = pnand %p717_p3, %p716_p2  ;;  %p724_p11 = scmp.lt.u32.totalorder %s715_s3, %s963_s21 }
  0x20   : > { %p723_p10 = por %p722_p7, %p721_p6 }
  0x21   : > { %p719_p5 = pneg %p718_p4 }
  0x22   : > { %p725_p13 = por %p724_p11, %p723_p10 }
  0x24   : > { %p726_p1 = pnand %p725_p13, %p719_p5 }
  0x26   : > { %729 = shalt.err (!%p726_p1)
}
  0x27   : > { %s730_s29 = scalar_lea.vmem %s952_s7, 4096  ;;  %s845_s17 = smov [#allocation2]  }
  0x28   : > { %p731_p2 = scmp.ne.s32.totalorder %s952_s7, %s730_s29  ;;  %s735_s22 = sshll.u32 %s845_s17, 4  ;;  %s736_s22 = int_to_ptr.vmem [resolvable:$false] %s735_s22 }
  0x29   : > { %s737_s26 = scalar_lea.vmem %s736_s22, 8192  ;;  %p738_p9 = scmp.lt.s32.totalorder %s952_s7, %s736_s22 }
  0x2a   : > { %p733_p4 = pnand %p731_p2, %p717_p3  ;;  %p739_p6 = scmp.lt.s32.totalorder %s737_s26, %s730_s29 }
  0x2c   : > { %p734_p12 = pneg %p733_p4  ;;  %p740_p7 = por %p739_p6, %p738_p9 }
  0x2e   : > { %p741_p10 = pnand %p740_p7, %p734_p12 }
  0x30   : > { %744 = shalt.err (!%p741_p10)
}
  0x31   : > { %s846_s3 = smov 1024   ;;  %s847_s23 = smov 256  }
  0x32   : > { %s848_s4 = smov 16   ;;  %p161_p1 = scmp.lt.s32.totalorder %s843_s16, 9 }
  0x33   : > { %634 = dma.hbm_to_vmem [thread:$0]  (!%p956_p0), %s963_s21, 4096, %s952_s7, %s966_s27, %s846_s3, %s847_s23, %s848_s4  }
  0x34   : > { %p1292_p3 = scmp.ge.s32.totalorder %s843_s16, 1 }
  0x36   : > { %p162_p5 = pnand %p1292_p3, %p161_p1 }
  0x37   : > { %s998_s5 = sand.u32 (!%p162_p5), 1, %s819_s10  }
  0x38   : > { %165 = sbr.rel (%p162_p5) target bundleno = 250 (0xfa), region = 28  ;;  %s613_s6 = sshll.u32 (!%p162_p5), %s998_s5, 8 }
  0x39   : > { %s168_s8 = scalar_lea.sflag (!%p162_p5), [#allocation3], %s998_s5  ;;  %s1004_s29 = scalar_lea.vmem (!%p162_p5), [#allocation2], %s613_s6 }
  0x3f   : > { %806 = dma.done.wait (%p931_p8), %s168_s8, 4096  }
  0x40   : > { %808 = vsyncadd (%p931_p8), %s168_s8, 4294963200  ;;  %s615_s7 = sshll.u32 %s831_s13, 4  ;;  %v849_v0 = vmov 0   ;;  %s617_s18 = sshll.u32 %s827_s12, 8  ;;  %v255_v34 = vlaneseq  ;;  %v227_v35 = vld [vmem:[%s1004_s29 + $0x20] sm:$0xff]  ;;  %v228_v37 = vld [vmem:[%s1004_s29 + $0x28] sm:$0xff] }
  0x41   : > { %714 = vset.pattern.permute.xlu1 %v849_v0  ;;  %713 = vset.pattern.permute.xlu0 %v849_v0  ;;  %p198_p9 = scmp.lt.s32.totalorder %s615_s7, 31  ;;  %v259_v1 = vstv %s617_s18  ;;  %v223_v38 = vld [vmem:[%s1004_s29] sm:$0xff]  ;;  %v224_v39 = vld [vmem:[%s1004_s29 + $0x8] sm:$0xff]  ;;  %v229_v40 = vld [vmem:[%s1004_s29 + $0x30] sm:$0xff]  ;;  %v360_v47 = vmul.f32 64.0, %v227_v35  ;;  %v361_v51 = vmul.f32 64.0, %v228_v37 }
  0x42   : > { %v1034_v36 = vand.u32 127, %v255_v34  ;;  %v230_v41 = vld [vmem:[%s1004_s29 + $0x38] sm:$0xff]  ;;  %v225_v42 = vld [vmem:[%s1004_s29 + $0x10] sm:$0xff]  ;;  %v231_v48 = vld [vmem:[%s1004_s29 + $0x40] sm:$0xff]  ;;  %v356_v52 = vmul.f32 64.0, %v223_v38  ;;  %v357_v53 = vmul.f32 64.0, %v224_v39 }
  0x43   : > { %s1309_s7 = smov (!%p198_p9, %s615_s7), 31  ;;  %v226_v43 = vld [vmem:[%s1004_s29 + $0x18] sm:$0xff]  ;;  %v233_v44 = vld [vmem:[%s1004_s29 + $0x50] sm:$0xff]  ;;  %v232_v49 = vld [vmem:[%s1004_s29 + $0x48] sm:$0xff]  ;;  %v362_v54 = vmul.f32 64.0, %v229_v40  ;;  %v363_v55 = vmul.f32 64.0, %v230_v41 }
  0x44   : > { %s616_s21 = sshll.u32 %s1309_s7, 3  ;;  %v234_v45 = vld [vmem:[%s1004_s29 + $0x58] sm:$0xff]  ;;  %v1046_v46 = vadd.s32 128, %v1034_v36  ;;  %v237_v50 = vld [vmem:[%s1004_s29 + $0x70] sm:$0xff]  ;;  %v358_v56 = vmul.f32 64.0, %v225_v42  ;;  %v1051_v57 = vmul.f32 64.0, %v226_v43 }
  0x45   : > { %s1015_s22 = scalar_lea.vmem %s1283_s0, %s616_s21  ;;  %v1053_v58 = vmul.f32 64.0, %v233_v44  ;;  %v1055_v61 = vmul.f32 64.0, %v234_v45  ;;  %v1057_v62 = vmul.f32 64.0, %v231_v48  ;;  %v1059_v63 = vmul.f32 64.0, %v232_v49  ;;  %s1082_s24 = scalar_lea.vmem [#allocation5], %s613_s6  ;;  %v240_v34 = vld [vmem:[%s1004_s29 + $0x88] sm:$0xff] }
  0x46   : > { %v209_v2 = vld [vmem:[%s1015_s22 + $0x10] sm:$0xff]  ;;  %v207_v3 = vld [vmem:[%s1015_s22] sm:$0xff]  ;;  %v210_v4 = vld [vmem:[%s1015_s22 + $0x18] sm:$0xff]  ;;  %v1061_v0 = vmul.f32 64.0, %v237_v50  ;;  %v1125_v49 = vmul.f32 64.0, %v240_v34  ;;  %s620_s26 = sshll.u32 %s827_s12, 1 }
  0x47   : > { %v262_v5 = vsub.s32 %v209_v2, %v259_v1  ;;  %v260_v6 = vsub.s32 %v207_v3, %v259_v1  ;;  %v208_v7 = vld [vmem:[%s1015_s22 + $0x8] sm:$0xff]  ;;  %v263_v8 = vsub.s32 %v210_v4, %v259_v1  ;;  %v211_v11 = vld [vmem:[%s1015_s22 + $0x20] sm:$0xff]  ;;  %v214_v14 = vld [vmem:[%s1015_s22 + $0x38] sm:$0xff]  ;;  %v850_v4 = vmov 0.0   ;;  %s626_s3 = sshll.u32 %s831_s13, 7  ;;  %s501_s23 = sshll.u32 %s1082_s24, 4  ;;  %s1225_s23 = int_to_ptr.vmem [resolvable:$true] %s501_s23 }
  0x48   : > { %v261_v9 = vsub.s32 %v208_v7, %v259_v1  ;;  %v212_v10 = vld [vmem:[%s1015_s22 + $0x28] sm:$0xff]  ;;  %v264_v13 = vsub.s32 %v211_v11, %v259_v1  ;;  %v213_v15 = vld [vmem:[%s1015_s22 + $0x30] sm:$0xff]  ;;  %v267_v16 = vsub.s32 %v214_v14, %v259_v1  ;;  %v215_v19 = vld [vmem:[%s1015_s22 + $0x40] sm:$0xff]  ;;  %s1190_s12 = sadd.s32 %s626_s3, %s620_s26  ;;  %s745_s7 = scalar_lea.vmem %s1225_s23, 4096 }
  0x49   : > { %283 = vperm.xlu1 %714, %v262_v5   ;;  %277 = vperm.xlu0 %713, %v260_v6   ;;  %v265_v12 = vsub.s32 %v212_v10, %v259_v1  ;;  %v266_v17 = vsub.s32 %v213_v15, %v259_v1  ;;  %v216_v18 = vld [vmem:[%s1015_s22 + $0x48] sm:$0xff]  ;;  %v268_v21 = vsub.s32 %v215_v19, %v259_v1  ;;  %v218_v22 = vld [vmem:[%s1015_s22 + $0x58] sm:$0xff]  ;;  %v217_v23 = vld [vmem:[%s1015_s22 + $0x50] sm:$0xff]  ;;  %s622_s13 = sshll.u32 %s1190_s12, 7  ;;  %p746_p8 = scmp.ne.s32.totalorder %s1225_s23, %s745_s7 }
  0x4a   : > { %v269_v20 = vsub.s32 %v216_v18, %v259_v1  ;;  %v271_v24 = vsub.s32 %v218_v22, %v259_v1  ;;  %v270_v25 = vsub.s32 %v217_v23, %v259_v1  ;;  %v220_v26 = vld [vmem:[%s1015_s22 + $0x68] sm:$0xff]  ;;  %v219_v27 = vld [vmem:[%s1015_s22 + $0x60] sm:$0xff]  ;;  %v222_v30 = vld [vmem:[%s1015_s22 + $0x78] sm:$0xff]  ;;  %s1222_s8 = scalar_lea.hbm %s1285_s2, %s622_s13  ;;  %p1293_p12 = scmp.ne.s32.totalorder %s1289_s25, 0 }
  0x4b   : > { %v273_v28 = vsub.s32 %v220_v26, %v259_v1  ;;  %v272_v29 = vsub.s32 %v219_v27, %v259_v1  ;;  %v221_v31 = vld [vmem:[%s1015_s22 + $0x70] sm:$0xff]  ;;  %v275_v32 = vsub.s32 %v222_v30, %v259_v1  ;;  %v235_v2 = vld [vmem:[%s1004_s29 + $0x60] sm:$0xff]  ;;  %v236_v3 = vld [vmem:[%s1004_s29 + $0x68] sm:$0xff]  ;;  %s851_s18 = smov [#allocation5]  }
  0x4c   : > { %v274_v33 = vsub.s32 %v221_v31, %v259_v1  ;;  %v238_v1 = vld [vmem:[%s1004_s29 + $0x78] sm:$0xff]  ;;  %v241_v18 = vld [vmem:[%s1004_s29 + $0x90] sm:$0xff]  ;;  %p747_p0 = pnand %p746_p8, %p1293_p12  ;;  %s749_s21 = sshll.u32 %s851_s18, 4  ;;  %s750_s21 = int_to_ptr.vmem [resolvable:$false] %s749_s21 }
  0x4d   : > { %286 = vperm.xlu1 %714, %v263_v8   ;;  %280 = vperm.xlu0 %713, %v261_v9   ;;  %v1074_v15 = vmul.f32 64.0, %v238_v1  ;;  %v242_v19 = vld [vmem:[%s1004_s29 + $0x98] sm:$0xff]  ;;  %v1100_v31 = vmul.f32 64.0, %v241_v18  ;;  %v245_v35 = vld [vmem:[%s1004_s29 + $0xb0] sm:$0xff]  ;;  %s751_s27 = scalar_lea.vmem %s750_s21, 8192  ;;  %p752_p13 = scmp.lt.s32.totalorder %s1225_s23, %s750_s21 }
  0x4e   : > { %v246_v37 = vld [vmem:[%s1004_s29 + $0xb8] sm:$0xff]  ;;  %v1127_v50 = vmul.f32 64.0, %v245_v35  ;;  %p748_p11 = pneg %p747_p0  ;;  %p753_p2 = scmp.lt.s32.totalorder %s751_s27, %s745_s7 }
  0x50   : > { %p754_p4 = por %p753_p2, %p752_p13 }
  0x51   : > { %292 = vperm.xlu1 %714, %v265_v12   ;;  %289 = vperm.xlu0 %713, %v264_v13  }
  0x52   : > { %p755_p6 = pnand %p754_p4, %p748_p11 }
  0x55   : > { %298 = vperm.xlu1 %714, %v267_v16   ;;  %295 = vperm.xlu0 %713, %v266_v17   ;;  %v1076_v16 = vmul.f32 64.0, %v235_v2  ;;  %v1078_v17 = vmul.f32 64.0, %v236_v3 }
  0x59   : > { %304 = vperm.xlu1 %714, %v269_v20   ;;  %301 = vperm.xlu0 %713, %v268_v21   ;;  %v239_v20 = vld [vmem:[%s1004_s29 + $0x80] sm:$0xff] }
  0x5d   : > { %310 = vperm.xlu1 %714, %v271_v24   ;;  %307 = vperm.xlu0 %713, %v270_v25  }
  0x61   : > { %316 = vperm.xlu1 %714, %v273_v28   ;;  %313 = vperm.xlu0 %713, %v272_v29  }
  0x65   : > { %322 = vperm.xlu1 %714, %v275_v32   ;;  %319 = vperm.xlu0 %713, %v274_v33   ;;  %v1102_v32 = vmul.f32 64.0, %v242_v19  ;;  %v1104_v33 = vmul.f32 64.0, %v239_v20 }
  0xc8   : > { %v284_v59 = vpop.permute.xlu1 %283  ;;  %v278_v60 = vpop.permute.xlu0 %277 }
  0xc9   : > { %vm328_vm0 = vcmp.eq.s32.totalorder %v1034_v36, %v284_v59  ;;  %vm329_vm1 = vcmp.eq.s32.totalorder %v1046_v46, %v284_v59  ;;  %vm324_vm2 = vcmp.eq.s32.totalorder %v1034_v36, %v278_v60  ;;  %vm325_vm3 = vcmp.eq.s32.totalorder %v1046_v46, %v278_v60 }
  0xca   : > { %v392_v5 = vsel %vm328_vm0, 25.6, %v850_v4  ;;  %v393_v6 = vsel %vm329_vm1, 25.6, %v850_v4  ;;  %v388_v7 = vsel %vm324_vm2, 25.6, %v850_v4 }
  0xcb   : > { %v424_v8 = vsub.f32 %v360_v47, %v392_v5  ;;  %v425_v9 = vsub.f32 %v361_v51, %v393_v6  ;;  %v389_v10 = vsel %vm325_vm3, 25.6, %v850_v4  ;;  %v420_v11 = vsub.f32 %v356_v52, %v388_v7  ;;  %v243_v52 = vld [vmem:[%s1004_s29 + $0xa0] sm:$0xff]  ;;  %v248_v7 = vld [vmem:[%s1004_s29 + $0xc8] sm:$0xff] }
  0xcc   : > { %v421_v12 = vsub.f32 %v357_v53, %v389_v10  ;;  %v287_v13 = vpop.permute.xlu1 %286  ;;  %v281_v14 = vpop.permute.xlu0 %280  ;;  %v1129_v51 = vmul.f32 64.0, %v246_v37  ;;  %v244_v53 = vld [vmem:[%s1004_s29 + $0xa8] sm:$0xff]  ;;  %v376_v2 = vmul.f32 64.0, %v243_v52  ;;  %v247_v6 = vld [vmem:[%s1004_s29 + $0xc0] sm:$0xff]  ;;  %v381_v20 = vmul.f32 64.0, %v248_v7 }
  0xcd   : > { %456 = vst [vmem:[%s1082_s24 + $0x20] sm:$0xff] %v424_v8  ;;  %457 = vst [vmem:[%s1082_s24 + $0x28] sm:$0xff] %v425_v9  ;;  %vm330_vm4 = vcmp.eq.s32.totalorder %v1034_v36, %v287_v13  ;;  %vm331_vm5 = vcmp.eq.s32.totalorder %v1046_v46, %v287_v13  ;;  %vm326_vm6 = vcmp.eq.s32.totalorder %v1034_v36, %v281_v14  ;;  %v377_v3 = vmul.f32 64.0, %v244_v53 }
  0xce   : > { %452 = vst [vmem:[%s1082_s24] sm:$0xff] %v420_v11  ;;  %vm327_vm7 = vcmp.eq.s32.totalorder %v1046_v46, %v281_v14  ;;  %453 = vst [vmem:[%s1082_s24 + $0x8] sm:$0xff] %v421_v12  ;;  %v394_v21 = vsel %vm330_vm4, 25.6, %v850_v4  ;;  %v395_v22 = vsel %vm331_vm5, 25.6, %v850_v4  ;;  %v380_v19 = vmul.f32 64.0, %v247_v6 }
  0xcf   : > { %v390_v23 = vsel %vm326_vm6, 25.6, %v850_v4  ;;  %v426_v24 = vsub.f32 %v362_v54, %v394_v21  ;;  %v427_v25 = vsub.f32 %v363_v55, %v395_v22  ;;  %v391_v26 = vsel %vm327_vm7, 25.6, %v850_v4  ;;  %v249_v54 = vld [vmem:[%s1004_s29 + $0xd0] sm:$0xff]  ;;  %v254_v22 = vld [vmem:[%s1004_s29 + $0xf8] sm:$0xff] }
  0xd0   : > { %v422_v27 = vsub.f32 %v358_v56, %v390_v23  ;;  %v423_v28 = vsub.f32 %v1051_v57, %v391_v26  ;;  %v293_v29 = vpop.permute.xlu1 %292  ;;  %v290_v30 = vpop.permute.xlu0 %289  ;;  %v1150_v5 = vmul.f32 64.0, %v249_v54  ;;  %v253_v21 = vld [vmem:[%s1004_s29 + $0xf0] sm:$0xff]  ;;  %v251_v23 = vld [vmem:[%s1004_s29 + $0xe0] sm:$0xff]  ;;  %v387_v35 = vmul.f32 64.0, %v254_v22 }
  0xd1   : > { %458 = vst [vmem:[%s1082_s24 + $0x30] sm:$0xff] %v426_v24  ;;  %459 = vst [vmem:[%s1082_s24 + $0x38] sm:$0xff] %v427_v25  ;;  %vm334_vm8 = vcmp.eq.s32.totalorder %v1034_v36, %v293_v29  ;;  %vm335_vm9 = vcmp.eq.s32.totalorder %v1046_v46, %v293_v29  ;;  %vm332_vm10 = vcmp.eq.s32.totalorder %v1034_v36, %v290_v30  ;;  %v386_v34 = vmul.f32 64.0, %v253_v21 }
  0xd2   : > { %454 = vst [vmem:[%s1082_s24 + $0x10] sm:$0xff] %v422_v27  ;;  %vm333_vm11 = vcmp.eq.s32.totalorder %v1046_v46, %v290_v30  ;;  %455 = vst [vmem:[%s1082_s24 + $0x18] sm:$0xff] %v423_v28  ;;  %v398_v38 = vsel %vm334_vm8, 25.6, %v850_v4  ;;  %v399_v39 = vsel %vm335_vm9, 25.6, %v850_v4 }
  0xd3   : > { %v396_v40 = vsel %vm332_vm10, 25.6, %v850_v4  ;;  %v430_v41 = vsub.f32 %v1053_v58, %v398_v38  ;;  %v431_v42 = vsub.f32 %v1055_v61, %v399_v39  ;;  %v397_v43 = vsel %vm333_vm11, 25.6, %v850_v4  ;;  %v252_v38 = vld [vmem:[%s1004_s29 + $0xe8] sm:$0xff] }
  0xd4   : > { %v428_v44 = vsub.f32 %v1057_v62, %v396_v40  ;;  %v429_v45 = vsub.f32 %v1059_v63, %v397_v43  ;;  %v299_v47 = vpop.permute.xlu1 %298  ;;  %v296_v48 = vpop.permute.xlu0 %295  ;;  %v384_v37 = vmul.f32 64.0, %v251_v23 }
  0xd5   : > { %462 = vst [vmem:[%s1082_s24 + $0x50] sm:$0xff] %v430_v41  ;;  %463 = vst [vmem:[%s1082_s24 + $0x58] sm:$0xff] %v431_v42  ;;  %vm338_vm12 = vcmp.eq.s32.totalorder %v1034_v36, %v299_v47  ;;  %vm339_vm13 = vcmp.eq.s32.totalorder %v1046_v46, %v299_v47  ;;  %vm336_vm14 = vcmp.eq.s32.totalorder %v1034_v36, %v296_v48 }
  0xd6   : > { %460 = vst [vmem:[%s1082_s24 + $0x40] sm:$0xff] %v428_v44  ;;  %vm337_vm15 = vcmp.eq.s32.totalorder %v1046_v46, %v296_v48  ;;  %461 = vst [vmem:[%s1082_s24 + $0x48] sm:$0xff] %v429_v45  ;;  %v402_v55 = vsel %vm338_vm12, 25.6, %v850_v4  ;;  %v403_v56 = vsel %vm339_vm13, 25.6, %v850_v4 }
  0xd7   : > { %v400_v57 = vsel %vm336_vm14, 25.6, %v850_v4  ;;  %v434_v58 = vsub.f32 %v1061_v0, %v402_v55  ;;  %v435_v59 = vsub.f32 %v1074_v15, %v403_v56  ;;  %v401_v60 = vsel %vm337_vm15, 25.6, %v850_v4  ;;  %v250_v0 = vld [vmem:[%s1004_s29 + $0xd8] sm:$0xff]  ;;  %s485_s29 = scalar_lea.sflag [#allocation4], %s998_s5 }
  0xd8   : > { %v432_v61 = vsub.f32 %v1076_v16, %v400_v57  ;;  %v433_v62 = vsub.f32 %v1078_v17, %v401_v60  ;;  %v305_v63 = vpop.permute.xlu1 %304  ;;  %v302_v1 = vpop.permute.xlu0 %301  ;;  %v383_v18 = vmul.f32 64.0, %v250_v0 }
  0xd9   : > { %466 = vst [vmem:[%s1082_s24 + $0x70] sm:$0xff] %v434_v58  ;;  %467 = vst [vmem:[%s1082_s24 + $0x78] sm:$0xff] %v435_v59  ;;  %vm342_vm0 = vcmp.eq.s32.totalorder %v1034_v36, %v305_v63  ;;  %vm343_vm1 = vcmp.eq.s32.totalorder %v1046_v46, %v305_v63  ;;  %vm340_vm2 = vcmp.eq.s32.totalorder %v1034_v36, %v302_v1 }
  0xda   : > { %464 = vst [vmem:[%s1082_s24 + $0x60] sm:$0xff] %v432_v61  ;;  %vm341_vm3 = vcmp.eq.s32.totalorder %v1046_v46, %v302_v1  ;;  %465 = vst [vmem:[%s1082_s24 + $0x68] sm:$0xff] %v433_v62  ;;  %v406_v8 = vsel %vm342_vm0, 25.6, %v850_v4  ;;  %v407_v9 = vsel %vm343_vm1, 25.6, %v850_v4 }
  0xdb   : > { %v404_v10 = vsel %vm340_vm2, 25.6, %v850_v4  ;;  %v438_v11 = vsub.f32 %v1100_v31, %v406_v8  ;;  %v439_v12 = vsub.f32 %v1102_v32, %v407_v9  ;;  %v405_v13 = vsel %vm341_vm3, 25.6, %v850_v4 }
  0xdc   : > { %v436_v14 = vsub.f32 %v1104_v33, %v404_v10  ;;  %v437_v15 = vsub.f32 %v1125_v49, %v405_v13  ;;  %v311_v16 = vpop.permute.xlu1 %310  ;;  %v308_v17 = vpop.permute.xlu0 %307  ;;  %v385_v49 = vmul.f32 64.0, %v252_v38 }
  0xdd   : > { %470 = vst [vmem:[%s1082_s24 + $0x90] sm:$0xff] %v438_v11  ;;  %471 = vst [vmem:[%s1082_s24 + $0x98] sm:$0xff] %v439_v12  ;;  %vm346_vm4 = vcmp.eq.s32.totalorder %v1034_v36, %v311_v16  ;;  %vm347_vm5 = vcmp.eq.s32.totalorder %v1046_v46, %v311_v16  ;;  %vm344_vm6 = vcmp.eq.s32.totalorder %v1034_v36, %v308_v17 }
  0xde   : > { %468 = vst [vmem:[%s1082_s24 + $0x80] sm:$0xff] %v436_v14  ;;  %vm345_vm7 = vcmp.eq.s32.totalorder %v1046_v46, %v308_v17  ;;  %469 = vst [vmem:[%s1082_s24 + $0x88] sm:$0xff] %v437_v15  ;;  %v410_v24 = vsel %vm346_vm4, 25.6, %v850_v4  ;;  %v411_v25 = vsel %vm347_vm5, 25.6, %v850_v4 }
  0xdf   : > { %v408_v26 = vsel %vm344_vm6, 25.6, %v850_v4  ;;  %v442_v27 = vsub.f32 %v1127_v50, %v410_v24  ;;  %v443_v28 = vsub.f32 %v1129_v51, %v411_v25  ;;  %v409_v29 = vsel %vm345_vm7, 25.6, %v850_v4 }
  0xe0   : > { %v440_v30 = vsub.f32 %v376_v2, %v408_v26  ;;  %v441_v31 = vsub.f32 %v377_v3, %v409_v29  ;;  %v317_v32 = vpop.permute.xlu1 %316  ;;  %v314_v33 = vpop.permute.xlu0 %313 }
  0xe1   : > { %474 = vst [vmem:[%s1082_s24 + $0xb0] sm:$0xff] %v442_v27  ;;  %475 = vst [vmem:[%s1082_s24 + $0xb8] sm:$0xff] %v443_v28  ;;  %vm350_vm8 = vcmp.eq.s32.totalorder %v1034_v36, %v317_v32  ;;  %vm351_vm9 = vcmp.eq.s32.totalorder %v1046_v46, %v317_v32  ;;  %vm348_vm10 = vcmp.eq.s32.totalorder %v1034_v36, %v314_v33 }
  0xe2   : > { %472 = vst [vmem:[%s1082_s24 + $0xa0] sm:$0xff] %v440_v30  ;;  %vm349_vm11 = vcmp.eq.s32.totalorder %v1046_v46, %v314_v33  ;;  %473 = vst [vmem:[%s1082_s24 + $0xa8] sm:$0xff] %v441_v31  ;;  %v414_v39 = vsel %vm350_vm8, 25.6, %v850_v4  ;;  %v415_v40 = vsel %vm351_vm9, 25.6, %v850_v4 }
  0xe3   : > { %v412_v41 = vsel %vm348_vm10, 25.6, %v850_v4  ;;  %v446_v42 = vsub.f32 %v1150_v5, %v414_v39  ;;  %v447_v43 = vsub.f32 %v383_v18, %v415_v40  ;;  %v413_v44 = vsel %vm349_vm11, 25.6, %v850_v4 }
  0xe4   : > { %v444_v45 = vsub.f32 %v380_v19, %v412_v41  ;;  %v445_v47 = vsub.f32 %v381_v20, %v413_v44  ;;  %v323_v48 = vpop.permute.xlu1 %322  ;;  %v320_v50 = vpop.permute.xlu0 %319 }
  0xe5   : > { %478 = vst [vmem:[%s1082_s24 + $0xd0] sm:$0xff] %v446_v42  ;;  %479 = vst [vmem:[%s1082_s24 + $0xd8] sm:$0xff] %v447_v43  ;;  %vm354_vm12 = vcmp.eq.s32.totalorder %v1034_v36, %v323_v48  ;;  %vm355_vm13 = vcmp.eq.s32.totalorder %v1046_v46, %v323_v48  ;;  %vm352_vm14 = vcmp.eq.s32.totalorder %v1034_v36, %v320_v50 }
  0xe6   : > { %476 = vst [vmem:[%s1082_s24 + $0xc0] sm:$0xff] %v444_v45  ;;  %vm353_vm15 = vcmp.eq.s32.totalorder %v1046_v46, %v320_v50  ;;  %477 = vst [vmem:[%s1082_s24 + $0xc8] sm:$0xff] %v445_v47  ;;  %v418_v51 = vsel %vm354_vm12, 25.6, %v850_v4  ;;  %v419_v52 = vsel %vm355_vm13, 25.6, %v850_v4 }
  0xe7   : > { %v416_v53 = vsel %vm352_vm14, 25.6, %v850_v4  ;;  %v450_v54 = vsub.f32 %v386_v34, %v418_v51  ;;  %v451_v55 = vsub.f32 %v387_v35, %v419_v52  ;;  %v417_v36 = vsel %vm353_vm15, 25.6, %v850_v4 }
  0xe8   : > { %v448_v56 = vsub.f32 %v384_v37, %v416_v53  ;;  %v449_v46 = vsub.f32 %v385_v49, %v417_v36 }
  0xe9   : > { %482 = vst [vmem:[%s1082_s24 + $0xf0] sm:$0xff] %v450_v54  ;;  %483 = vst [vmem:[%s1082_s24 + $0xf8] sm:$0xff] %v451_v55 }
  0xea   : > { %480 = vst [vmem:[%s1082_s24 + $0xe0] sm:$0xff] %v448_v56  ;;  %481 = vst [vmem:[%s1082_s24 + $0xe8] sm:$0xff] %v449_v46 }
  0xeb   : > { %758 = shalt.err (!%p755_p6)
}
  0xec   : > { %s759_s17 = scalar_lea.hbm %s1222_s8, 4096  ;;  %s763_s26 = scalar_lea.hbm %s1285_s2, 32768 }
  0xed   : > { %p760_p7 = scmp.ne.s32.totalorder %s1222_s8, %s759_s17  ;;  %p764_p3 = scmp.lt.u32.totalorder %s1222_s8, %s1285_s2 }
  0xee   : > { %p765_p5 = scmp.lt.u32.totalorder %s763_s26, %s759_s17  ;;  %p767_p8 = scmp.lt.u32.totalorder %s759_s17, %s1222_s8 }
  0xef   : > { %p761_p10 = pnand %p760_p7, %p1293_p12 }
  0xf0   : > { %p766_p9 = por %p765_p5, %p764_p3 }
  0xf1   : > { %p762_p1 = pneg %p761_p10 }
  0xf2   : > { %p768_p0 = por %p767_p8, %p766_p9 }
  0xf4   : > { %p769_p11 = pnand %p768_p0, %p762_p1 }
  0xf6   : > { %772 = shalt.err (!%p769_p11)
}
  0xf7   : > { %s852_s13 = smov 256   ;;  %s853_s4 = smov 1024  }
  0xf8   : > { %s854_s6 = smov 16  }
  0xf9   : > { %629 = dma.vmem_to_hbm [thread:$0]  (%p1293_p12), %s1225_s23, 4096, %s1222_s8, %s485_s29, %s852_s13, %s853_s4, %s854_s6  }
  0xfa PF: > { %p640_p13 = scmp.ge.s32.totalorder %s843_s16, 2  ;;  %s516_s7 = sand.u32 1, %s815_s9  }
  0xfb   : > { %p1294_p2 = scmp.ne.s32.totalorder %s1290_s28, 0  ;;  %s517_s18 = scalar_lea.sflag [#allocation4], %s516_s7 }
  0xfd   : > { %p636_p4 = pnand %p640_p13, %p1294_p2 }
  0xff   : > { %810 = dma.done.wait (!%p636_p4), %s517_s18, 4096  }
 0x100   : > { %812 = vsyncadd (!%p636_p4), %s517_s18, 4294963200  ;;  %s18_s16 = sadd.s32 1, %s843_s16   ;;  %s1295_s9 = smov %s819_s10 }
 0x101   : > { %p15_p6 = scmp.ge.s32.totalorder %s18_s16, 10   ;;  %s1296_s10 = smov %s823_s11 }
 0x102   : > { %s1297_s11 = smov %s948_s30  ;;  %s1298_s12 = smov %s835_s14 }
 0x103   : > { %s1299_s13 = smov %s839_s15  ;;  %s1300_s14 = smov %s1303_s19 }
 0x104   : > { %s1301_s15 = smov %s1307_s20  ;;  %17 = sbr.rel (!%p15_p6) target bundleno = 7 (0x7), region = 76 }
 0x10b   :  { %522 = vsyncpa [#allocation3], 1 }
 0x10c   :  { %524 = vsyncpa [#allocation3 + $0x1], 1 }
 0x10d   :  { %525 = vsyncpa [#allocation4], 1 }
 0x10e   :  { %527 = vsyncpa [#allocation4 + $0x1], 1 }

</bundles_post_ra>
